<compile_context>
chip_gen: v5e
topology: v5e:2x2
jax: 0.10.0
libtpu: 0.0.40
codegen_flags: <defaults>
</compile_context>

<pallas_src>
import functools

import numpy as np
import jax
import jax.numpy as jnp
from jax import lax
from jax.experimental import pallas as pl
from jax.experimental.pallas import tpu as pltpu


# ---------------------------------------------------------------------------
# Kernel: whole EncoderBlock forward for `ipb` images per grid step.
#   x_ref    : (ipb*H,  W*Ci)            NHWC activation, rows = image rows
#   a1_ref   : (3,  (W+2)*Ci, W*Cm)      conv1 banded weights (gain folded)
#   b1_ref   : (1,  W*Cm)                conv1 bias, tiled over W (gain folded)
#   s_ref    : (6*ipb*Ho, ipb*(H+4))     0/1 stride-2 row-selection matrix
#   a2_ref   : (6,  (W+4)*Cm, Wo*Co)     blur-composed conv2 banded weights
#   b2_ref   : (1,  Wo*Co)               conv2 bias, tiled over Wo
#   feat_ref : (ipb*H,  W*Cm)            output 1 (conv1 activation)
#   out_ref  : (ipb*Ho, Wo*Co)           output 2 (downsampled)
#   xpad_ref : (ipb*(H+2), (W+2)*Ci)     VMEM scratch, zero-padded conv1 input
#   fpad_ref : (ipb*(H+4), (W+4)*Cm)     VMEM scratch, zero-padded conv2 input
# Column layout of the padded scratches puts the W real pixel positions first
# (cols [0, W*C)), pads last, so the activation writes are lane-aligned.
# ---------------------------------------------------------------------------
def _encoder_block_kernel(x_ref, a1_ref, b1_ref, s_ref, a2_ref, b2_ref,
                          feat_ref, out_ref, xpad_ref, fpad_ref, *,
                          ipb, alpha, clamp):
    H = x_ref.shape[0] // ipb
    Hp = xpad_ref.shape[0] // ipb
    Hpp = fpad_ref.shape[0] // ipb
    Ho = out_ref.shape[0] // ipb
    wci = x_ref.shape[1]            # W * Ci
    wcm = feat_ref.shape[1]         # W * Cm
    k1 = a1_ref.shape[0]            # 3
    k2 = a2_ref.shape[0]            # 6 (3x3 composed with 4x4 filter)
    rp1 = (Hp - H) // 2             # 1
    rp2 = (Hpp - H) // 2            # 2

    # zero the padded scratches once
    xpad_ref[...] = jnp.zeros_like(xpad_ref)
    fpad_ref[...] = jnp.zeros_like(fpad_ref)

    # embed the input into the zero-padded conv1 buffer (lane-aligned store)
    for n in range(ipb):                                    # static python loop
        xpad_ref[n * Hp + rp1:n * Hp + rp1 + H, 0:wci] = x_ref[n * H:(n + 1) * H, :]

    # ---- conv1: 3 banded MXU matmuls per image + bias + lrelu + clamp ----
    for n in range(ipb):
        acc = jnp.dot(xpad_ref[n * Hp:n * Hp + H, :], a1_ref[0],
                      preferred_element_type=jnp.float32)
        for kh in range(1, k1):
            acc = acc + jnp.dot(xpad_ref[n * Hp + kh:n * Hp + kh + H, :],
                                a1_ref[kh], preferred_element_type=jnp.float32)
        z = acc + b1_ref[...]
        z = jnp.where(z >= 0.0, z, alpha * z)               # leaky relu
        feat = jnp.clip(z, -clamp, clamp)                   # (sqrt2 gain already folded)
        feat_ref[n * H:(n + 1) * H, :] = feat.astype(feat_ref.dtype)
        # re-embed into the zero-padded conv2 buffer (stays in VMEM)
        fpad_ref[n * Hpp + rp2:n * Hpp + rp2 + H, 0:wcm] = feat

    # ---- conv2: blur + 3x3 stride-2 conv, composed into 6x6 stride-2 ----
    # stride-2 row selection done on the MXU via a constant 0/1 matrix
    g = jnp.dot(s_ref[...], fpad_ref[...], preferred_element_type=jnp.float32)
    rows = ipb * Ho
    acc2 = jnp.dot(g[0:rows, :], a2_ref[0], preferred_element_type=jnp.float32)
    for th in range(1, k2):
        acc2 = acc2 + jnp.dot(g[th * rows:(th + 1) * rows, :], a2_ref[th],
                              preferred_element_type=jnp.float32)
    z2 = acc2 + b2_ref[...]
    z2 = jnp.where(z2 >= 0.0, z2, alpha * z2)
    out_ref[...] = jnp.clip(z2, -clamp, clamp).astype(out_ref.dtype)


# ---------------------------------------------------------------------------
# Wrapper: weight prep (norm, gain fold, blur composition, banded matrices)
# + a single pallas_call.  Only 3 XLA ops touch the activation path
# (NCHW<->NHWC transposes); they vanish in an NHWC model.
# ---------------------------------------------------------------------------
def encoder_block_forward(x, w1, b1, w2, b2, *, gain=1.0, alpha=0.2,
                          act_gain=float(np.sqrt(2.0)), clamp=256.0,
                          resample_filter=(1.0, 3.0, 3.0, 1.0), down=2,
                          images_per_step=None):
    N, Ci, H, W = x.shape
    Cm, Ci1, K, K_ = w1.shape
    Co, Cm2, K2_, _ = w2.shape
    assert Ci1 == Ci and Cm2 == Cm and K == K_ == K2_
    assert H % down == 0 and W % down == 0

    f1 = np.asarray(resample_filter, np.float32)
    Kf = f1.size
    px0 = K // 2 + (Kf - down + 1) // 2
    px1 = K // 2 + (Kf - down) // 2
    assert px0 == px1, "asymmetric resample padding not supported"
    pad1, pad2 = K // 2, px0                  # 1, 2
    Hp, Wp = H + 2 * pad1, W + 2 * pad1       # 18, 18
    Hpp, Wpp = H + 2 * pad2, W + 2 * pad2     # 20, 20
    Kc = K + Kf - 1                           # 6
    Ho = (Hpp - Kc) // down + 1               # 8
    Wo = (Wpp - Kc) // down + 1               # 8

    f32 = jnp.float32
    ag = float(act_gain) * float(gain)        # lrelu_agc gain (foldable: lrelu is pos-homog.)
    cl = float(clamp) * float(gain)

    # ---- weight norm (eps inside sqrt, as in the module) + gain fold ----
    def wnorm(w):
        w = w.astype(f32)
        ssq = jnp.sum(w * w, axis=(1, 2, 3), keepdims=True)
        return w * lax.rsqrt(ssq + 1e-8)

    w1n = wnorm(w1) * ag
    w2n = wnorm(w2) * ag
    b1f = b1.astype(f32) * ag
    b2f = b2.astype(f32) * ag

    # ---- compose the (flipped) 4x4 resample filter into conv2 -> 6x6 kernel ----
    f2 = np.outer(f1, f1)
    f2 = f2 / f2.sum()
    f2 = f2[::-1, ::-1]                       # upfirdn2d flips f (symmetric: no-op)
    M = np.zeros((K, K, Kc, Kc), np.float32)
    for kh in range(K):
        for kw in range(K):
            M[kh, kw, kh:kh + Kf, kw:kw + Kf] = f2
    wc = jnp.einsum('ocij,ijtu->octu', w2n, jnp.asarray(M))   # (Co, Cm, 6, 6)

    # ---- banded width matrices (real pixel columns first, pad columns last) ----
    def colperm(n_padded, lo, width):
        pos = np.empty(n_padded, np.int64)
        pos[lo:lo + width] = np.arange(width)
        rest = [p for p in range(n_padded) if not (lo <= p < lo + width)]
        pos[rest] = np.arange(width, n_padded)
        return pos

    pos1 = colperm(Wp, pad1, W)
    pos2 = colperm(Wpp, pad2, W)

    T1 = np.zeros((Wp, W, K), np.float32)
    for w in range(W):
        for kw in range(K):
            T1[pos1[w + kw], w, kw] = 1.0
    w1t = jnp.transpose(w1n, (2, 3, 1, 0))                    # (kh, kw, cin, cout)
    a1 = jnp.einsum('pwk,hkcm->hpcwm', jnp.asarray(T1), w1t).reshape(K, Wp * Ci, W * Cm)

    T2 = np.zeros((Wpp, Wo, Kc), np.float32)
    for wo in range(Wo):
        for tw in range(Kc):
            T2[pos2[down * wo + tw], wo, tw] = 1.0
    wct = jnp.transpose(wc, (2, 3, 1, 0))                     # (th, tw, cin, cout)
    a2 = jnp.einsum('pwt,htco->hpcwo', jnp.asarray(T2), wct).reshape(Kc, Wpp * Cm, Wo * Co)

    b1row = jnp.tile(b1f, W).reshape(1, W * Cm)
    b2row = jnp.tile(b2f, Wo).reshape(1, Wo * Co)

    # ---- grid: single step by default (1 TC on v5e/v6e). `images_per_step`
    #      lets v7x benchmark a 2-step ("parallel") split across its 2 TCs. ----
    ipb = images_per_step if images_per_step is not None else N
    if N % ipb != 0 or (ipb < N and ((ipb * H) % 8 != 0 or (ipb * Ho) % 8 != 0)):
        ipb = N
    steps = N // ipb

    # stride-2 row-selection matrix (constant)
    S = np.zeros((Kc * ipb * Ho, ipb * Hpp), np.float32)
    for th in range(Kc):
        for n in range(ipb):
            for ho in range(Ho):
                S[th * ipb * Ho + n * Ho + ho, n * Hpp + down * ho + th] = 1.0
    s = jnp.asarray(S)

    # activation path: one transpose, reshape is a contiguous view of NHWC
    x2d = jnp.transpose(x.astype(f32), (0, 2, 3, 1)).reshape(N * H, W * Ci)

    kernel = functools.partial(_encoder_block_kernel, ipb=ipb,
                               alpha=float(alpha), clamp=cl)

    feat2d, out2d = pl.pallas_call(
        kernel,
        out_shape=(jax.ShapeDtypeStruct((N * H, W * Cm), f32),
                   jax.ShapeDtypeStruct((N * Ho, Wo * Co), f32)),
        grid=(steps,),
        in_specs=[
            pl.BlockSpec((ipb * H, W * Ci), lambda i: (i, 0)),
            pl.BlockSpec((K, Wp * Ci, W * Cm), lambda i: (0, 0, 0)),
            pl.BlockSpec((1, W * Cm), lambda i: (0, 0)),
            pl.BlockSpec((Kc * ipb * Ho, ipb * Hpp), lambda i: (0, 0)),
            pl.BlockSpec((Kc, Wpp * Cm, Wo * Co), lambda i: (0, 0, 0)),
            pl.BlockSpec((1, Wo * Co), lambda i: (0, 0)),
        ],
        out_specs=(
            pl.BlockSpec((ipb * H, W * Cm), lambda i: (i, 0)),
            pl.BlockSpec((ipb * Ho, Wo * Co), lambda i: (i, 0)),
        ),
        scratch_shapes=[
            pltpu.VMEM((ipb * Hp, Wp * Ci), f32),
            pltpu.VMEM((ipb * Hpp, Wpp * Cm), f32),
        ],
        compiler_params=pltpu.CompilerParams(
            dimension_semantics=("parallel",)),
    )(x2d, a1, b1row, s, a2, b2row)

    feat = jnp.transpose(feat2d.reshape(N, H, W, Cm), (0, 3, 1, 2))   # NCHW
    out = jnp.transpose(out2d.reshape(N, Ho, Wo, Co), (0, 3, 1, 2))   # NCHW
    return out, feat


# ---------------------------------------------------------------------------
# Pure-JAX reference mirroring the PyTorch ops (ground truth).
# ---------------------------------------------------------------------------
def _reference_encoder_block(x, w1, b1, w2, b2, *, gain=1.0, alpha=0.2,
                             act_gain=float(np.sqrt(2.0)), clamp=256.0,
                             resample_filter=(1.0, 3.0, 3.0, 1.0), down=2):
    f32 = jnp.float32
    x = x.astype(f32)

    def wnorm(w):
        w = w.astype(f32)
        ssq = jnp.sum(w * w, axis=(1, 2, 3), keepdims=True)
        return w * lax.rsqrt(ssq + 1e-8)

    def act(z):
        z = jnp.where(z >= 0.0, z, alpha * z)
        z = z * (act_gain * gain)
        return jnp.clip(z, -clamp * gain, clamp * gain)

    dn = ("NCHW", "OIHW", "NCHW")
    pad1 = w1.shape[-1] // 2
    y = lax.conv_general_dilated(x, wnorm(w1), (1, 1), ((pad1, pad1), (pad1, pad1)),
                                 dimension_numbers=dn)
    feat = act(y + b1.reshape(1, -1, 1, 1).astype(f32))

    f1 = jnp.asarray(resample_filter, f32)
    f2 = jnp.outer(f1, f1)
    f2 = f2 / jnp.sum(f2)
    f2 = f2[::-1, ::-1]                                     # upfirdn2d flip
    Cm = feat.shape[1]
    fdw = jnp.tile(f2[None, None], (Cm, 1, 1, 1))
    pad2 = w2.shape[-1] // 2 + (f1.size - down + 1) // 2
    xb = lax.conv_general_dilated(feat, fdw, (1, 1), ((pad2, pad2), (pad2, pad2)),
                                  dimension_numbers=dn, feature_group_count=Cm)
    y2 = lax.conv_general_dilated(xb, wnorm(w2), (down, down), ((0, 0), (0, 0)),
                                  dimension_numbers=dn)
    out = act(y2 + b2.reshape(1, -1, 1, 1).astype(f32))
    return out, feat


if __name__ == "__main__":
    # EncoderBlock(ic_n=4, oc_n=8): conv1 4->4 (3x3), conv2 4->8 (3x3, down=2)
    # rgb_n=None -> fromrgb unused, so `img` is ignored by forward().
    N, ic_n, oc_n, H, W = 2, 4, 8, 16, 16

    key = jax.random.PRNGKey(0)
    kx, k1, k2, kb1, kb2 = jax.random.split(key, 5)
    x = jax.random.normal(kx, (N, ic_n, H, W), dtype=jnp.float32)
    w1 = jax.random.normal(k1, (ic_n, ic_n, 3, 3), dtype=jnp.float32)
    w2 = jax.random.normal(k2, (oc_n, ic_n, 3, 3), dtype=jnp.float32)
    # module initializes biases to zero; small random values exercise the path
    b1 = 0.1 * jax.random.normal(kb1, (ic_n,), dtype=jnp.float32)
    b2 = 0.1 * jax.random.normal(kb2, (oc_n,), dtype=jnp.float32)

    fwd = jax.jit(lambda *a: encoder_block_forward(*a))
    out, feat = fwd(x, w1, b1, w2, b2)
    out = jax.block_until_ready(out)
    feat = jax.block_until_ready(feat)

    ref_out, ref_feat = _reference_encoder_block(x, w1, b1, w2, b2)
    assert feat.shape == (N, ic_n, H, W)
    assert out.shape == (N, oc_n, H // 2, W // 2)
    err_f = float(jnp.max(jnp.abs(feat - ref_feat)))
    err_o = float(jnp.max(jnp.abs(out - ref_out)))
    assert jnp.allclose(feat, ref_feat, atol=1e-4, rtol=1e-4), err_f
    assert jnp.allclose(out, ref_out, atol=1e-4, rtol=1e-4), err_o

    # TODO(synk): fromrgb (rgb_n != None), depthwise SeparableConv2d,
    # reparametrized multi-tensor weights, and noise injection are not used by
    # the default EncoderBlock config and are not implemented here.
    print("KERNEL_OK")
</pallas_src>

<mosaic_0001>
module attributes {stable_mosaic.version = 11 : i64} {
  func.func @_encoder_block_kernel(%arg0: i32, %arg1: memref<32x64xf32, #tpu.memory_space<vmem>>, %arg2: memref<3x72x64xf32, #tpu.memory_space<vmem>>, %arg3: memref<1x64xf32, #tpu.memory_space<vmem>>, %arg4: memref<96x40xf32, #tpu.memory_space<vmem>>, %arg5: memref<6x80x64xf32, #tpu.memory_space<vmem>>, %arg6: memref<1x64xf32, #tpu.memory_space<vmem>>, %arg7: memref<32x64xf32, #tpu.memory_space<vmem>>, %arg8: memref<16x64xf32, #tpu.memory_space<vmem>>, %arg9: memref<36x72xf32, #tpu.memory_space<vmem>>, %arg10: memref<40x80xf32, #tpu.memory_space<vmem>>) attributes {dimension_semantics = [#tpu.dimension_semantics<parallel>], iteration_bounds = array<i64: 1>, scalar_prefetch = 0 : i64, scratch_operands = 2 : i64, tpu.core_type = #tpu.core_type<tc>, window_params = [{transform_indices = @transform_0, window_bounds = array<i64: 32, 64>}, {pipeline_mode = #tpu.pipeline_mode<synchronous>, transform_indices = @transform_1, window_bounds = array<i64: 3, 72, 64>}, {pipeline_mode = #tpu.pipeline_mode<synchronous>, transform_indices = @transform_2, window_bounds = array<i64: 1, 64>}, {pipeline_mode = #tpu.pipeline_mode<synchronous>, transform_indices = @transform_3, window_bounds = array<i64: 96, 40>}, {pipeline_mode = #tpu.pipeline_mode<synchronous>, transform_indices = @transform_4, window_bounds = array<i64: 6, 80, 64>}, {pipeline_mode = #tpu.pipeline_mode<synchronous>, transform_indices = @transform_5, window_bounds = array<i64: 1, 64>}, {transform_indices = @transform_6, window_bounds = array<i64: 32, 64>}, {transform_indices = @transform_7, window_bounds = array<i64: 16, 64>}]} {
    %cst = arith.constant 0.000000e+00 : f32
    %0 = vector.broadcast %cst : f32 to vector<36x72xf32>
    %c0 = arith.constant 0 : index
    %c0_0 = arith.constant 0 : index
    %1 = vector.load %arg9[%c0, %c0_0] : memref<36x72xf32, #tpu.memory_space<vmem>>, vector<36x72xf32>
    tpu.vector_store %arg9[%c0, %c0_0], %0 {strides = array<i32>} : memref<36x72xf32, #tpu.memory_space<vmem>>, vector<36x72xf32>,
    %cst_1 = arith.constant 0.000000e+00 : f32
    %2 = vector.broadcast %cst_1 : f32 to vector<40x80xf32>
    %c0_2 = arith.constant 0 : index
    %c0_3 = arith.constant 0 : index
    %3 = vector.load %arg10[%c0_2, %c0_3] : memref<40x80xf32, #tpu.memory_space<vmem>>, vector<40x80xf32>
    tpu.vector_store %arg10[%c0_2, %c0_3], %2 {strides = array<i32>} : memref<40x80xf32, #tpu.memory_space<vmem>>, vector<40x80xf32>,
    %c0_4 = arith.constant 0 : index
    %c0_5 = arith.constant 0 : index
    %4 = vector.load %arg1[%c0_4, %c0_5] : memref<32x64xf32, #tpu.memory_space<vmem>>, vector<16x64xf32>
    %c1 = arith.constant 1 : index
    %c0_6 = arith.constant 0 : index
    %5 = vector.load %arg9[%c1, %c0_6] : memref<36x72xf32, #tpu.memory_space<vmem>>, vector<16x64xf32>
    tpu.vector_store %arg9[%c1, %c0_6], %4 {strides = array<i32>} : memref<36x72xf32, #tpu.memory_space<vmem>>, vector<16x64xf32>,
    %c16 = arith.constant 16 : index
    %c0_7 = arith.constant 0 : index
    %6 = vector.load %arg1[%c16, %c0_7] : memref<32x64xf32, #tpu.memory_space<vmem>>, vector<16x64xf32>
    %c19 = arith.constant 19 : index
    %c0_8 = arith.constant 0 : index
    %7 = vector.load %arg9[%c19, %c0_8] : memref<36x72xf32, #tpu.memory_space<vmem>>, vector<16x64xf32>
    tpu.vector_store %arg9[%c19, %c0_8], %6 {strides = array<i32>} : memref<36x72xf32, #tpu.memory_space<vmem>>, vector<16x64xf32>,
    %c0_9 = arith.constant 0 : index
    %c0_10 = arith.constant 0 : index
    %8 = vector.load %arg9[%c0_9, %c0_10] : memref<36x72xf32, #tpu.memory_space<vmem>>, vector<16x72xf32>
    %c0_11 = arith.constant 0 : index
    %c0_12 = arith.constant 0 : index
    %c0_13 = arith.constant 0 : index
    %9 = vector.load %arg2[%c0_11, %c0_12, %c0_13] : memref<3x72x64xf32, #tpu.memory_space<vmem>>, vector<1x72x64xf32>
    %10 = vector.shape_cast %9 : vector<1x72x64xf32> to vector<72x64xf32>
    %cst_14 = arith.constant dense<0.000000e+00> : vector<16x64xf32>
    %11 = tpu.matmul %8, %10, %cst_14 {dimension_numbers = #tpu.dot_dimension_numbers<[1], [0], [0], [1], [0, 0, 1, 1], [], []>} : vector<16x72xf32>, vector<72x64xf32>, vector<16x64xf32> -> vector<16x64xf32>
    %c1_15 = arith.constant 1 : index
    %c0_16 = arith.constant 0 : index
    %12 = vector.load %arg9[%c1_15, %c0_16] : memref<36x72xf32, #tpu.memory_space<vmem>>, vector<16x72xf32>
    %c1_17 = arith.constant 1 : index
    %c0_18 = arith.constant 0 : index
    %c0_19 = arith.constant 0 : index
    %13 = vector.load %arg2[%c1_17, %c0_18, %c0_19] : memref<3x72x64xf32, #tpu.memory_space<vmem>>, vector<1x72x64xf32>
    %14 = vector.shape_cast %13 : vector<1x72x64xf32> to vector<72x64xf32>
    %cst_20 = arith.constant dense<0.000000e+00> : vector<16x64xf32>
    %15 = tpu.matmul %12, %14, %cst_20 {dimension_numbers = #tpu.dot_dimension_numbers<[1], [0], [0], [1], [0, 0, 1, 1], [], []>} : vector<16x72xf32>, vector<72x64xf32>, vector<16x64xf32> -> vector<16x64xf32>
    %16 = arith.addf %11, %15 : vector<16x64xf32>
    %c2 = arith.constant 2 : index
    %c0_21 = arith.constant 0 : index
    %17 = vector.load %arg9[%c2, %c0_21] : memref<36x72xf32, #tpu.memory_space<vmem>>, vector<16x72xf32>
    %c2_22 = arith.constant 2 : index
    %c0_23 = arith.constant 0 : index
    %c0_24 = arith.constant 0 : index
    %18 = vector.load %arg2[%c2_22, %c0_23, %c0_24] : memref<3x72x64xf32, #tpu.memory_space<vmem>>, vector<1x72x64xf32>
    %19 = vector.shape_cast %18 : vector<1x72x64xf32> to vector<72x64xf32>
    %cst_25 = arith.constant dense<0.000000e+00> : vector<16x64xf32>
    %20 = tpu.matmul %17, %19, %cst_25 {dimension_numbers = #tpu.dot_dimension_numbers<[1], [0], [0], [1], [0, 0, 1, 1], [], []>} : vector<16x72xf32>, vector<72x64xf32>, vector<16x64xf32> -> vector<16x64xf32>
    %21 = arith.addf %16, %20 : vector<16x64xf32>
    %c0_26 = arith.constant 0 : index
    %c0_27 = arith.constant 0 : index
    %22 = vector.load %arg3[%c0_26, %c0_27] : memref<1x64xf32, #tpu.memory_space<vmem>>, vector<1x64xf32>
    %23 = vector.broadcast %22 : vector<1x64xf32> to vector<16x64xf32>
    %24 = arith.addf %21, %23 : vector<16x64xf32>
    %cst_28 = arith.constant 0.000000e+00 : f32
    %25 = vector.broadcast %cst_28 : f32 to vector<16x64xf32>
    %26 = arith.cmpf oge, %24, %25 : vector<16x64xf32>
    %cst_29 = arith.constant 2.000000e-01 : f32
    %27 = vector.broadcast %cst_29 : f32 to vector<16x64xf32>
    %28 = arith.mulf %27, %24 : vector<16x64xf32>
    %29 = arith.select %26, %24, %28 : vector<16x64xi1>, vector<16x64xf32>
    %cst_30 = arith.constant -2.560000e+02 : f32
    %cst_31 = arith.constant 2.560000e+02 : f32
    %30 = vector.broadcast %cst_30 : f32 to vector<16x64xf32>
    %31 = arith.maximumf %30, %29 : vector<16x64xf32>
    %32 = vector.broadcast %cst_31 : f32 to vector<16x64xf32>
    %33 = arith.minimumf %32, %31 : vector<16x64xf32>
    %c0_32 = arith.constant 0 : index
    %c0_33 = arith.constant 0 : index
    %34 = vector.load %arg7[%c0_32, %c0_33] : memref<32x64xf32, #tpu.memory_space<vmem>>, vector<16x64xf32>
    tpu.vector_store %arg7[%c0_32, %c0_33], %33 {strides = array<i32>} : memref<32x64xf32, #tpu.memory_space<vmem>>, vector<16x64xf32>,
    %c2_34 = arith.constant 2 : index
    %c0_35 = arith.constant 0 : index
    %35 = vector.load %arg10[%c2_34, %c0_35] : memref<40x80xf32, #tpu.memory_space<vmem>>, vector<16x64xf32>
    tpu.vector_store %arg10[%c2_34, %c0_35], %33 {strides = array<i32>} : memref<40x80xf32, #tpu.memory_space<vmem>>, vector<16x64xf32>,
    %c18 = arith.constant 18 : index
    %c0_36 = arith.constant 0 : index
    %36 = vector.load %arg9[%c18, %c0_36] : memref<36x72xf32, #tpu.memory_space<vmem>>, vector<16x72xf32>
    %c0_37 = arith.constant 0 : index
    %c0_38 = arith.constant 0 : index
    %c0_39 = arith.constant 0 : index
    %37 = vector.load %arg2[%c0_37, %c0_38, %c0_39] : memref<3x72x64xf32, #tpu.memory_space<vmem>>, vector<1x72x64xf32>
    %38 = vector.shape_cast %37 : vector<1x72x64xf32> to vector<72x64xf32>
    %cst_40 = arith.constant dense<0.000000e+00> : vector<16x64xf32>
    %39 = tpu.matmul %36, %38, %cst_40 {dimension_numbers = #tpu.dot_dimension_numbers<[1], [0], [0], [1], [0, 0, 1, 1], [], []>} : vector<16x72xf32>, vector<72x64xf32>, vector<16x64xf32> -> vector<16x64xf32>
    %c19_41 = arith.constant 19 : index
    %c0_42 = arith.constant 0 : index
    %40 = vector.load %arg9[%c19_41, %c0_42] : memref<36x72xf32, #tpu.memory_space<vmem>>, vector<16x72xf32>
    %c1_43 = arith.constant 1 : index
    %c0_44 = arith.constant 0 : index
    %c0_45 = arith.constant 0 : index
    %41 = vector.load %arg2[%c1_43, %c0_44, %c0_45] : memref<3x72x64xf32, #tpu.memory_space<vmem>>, vector<1x72x64xf32>
    %42 = vector.shape_cast %41 : vector<1x72x64xf32> to vector<72x64xf32>
    %cst_46 = arith.constant dense<0.000000e+00> : vector<16x64xf32>
    %43 = tpu.matmul %40, %42, %cst_46 {dimension_numbers = #tpu.dot_dimension_numbers<[1], [0], [0], [1], [0, 0, 1, 1], [], []>} : vector<16x72xf32>, vector<72x64xf32>, vector<16x64xf32> -> vector<16x64xf32>
    %44 = arith.addf %39, %43 : vector<16x64xf32>
    %c20 = arith.constant 20 : index
    %c0_47 = arith.constant 0 : index
    %45 = vector.load %arg9[%c20, %c0_47] : memref<36x72xf32, #tpu.memory_space<vmem>>, vector<16x72xf32>
    %c2_48 = arith.constant 2 : index
    %c0_49 = arith.constant 0 : index
    %c0_50 = arith.constant 0 : index
    %46 = vector.load %arg2[%c2_48, %c0_49, %c0_50] : memref<3x72x64xf32, #tpu.memory_space<vmem>>, vector<1x72x64xf32>
    %47 = vector.shape_cast %46 : vector<1x72x64xf32> to vector<72x64xf32>
    %cst_51 = arith.constant dense<0.000000e+00> : vector<16x64xf32>
    %48 = tpu.matmul %45, %47, %cst_51 {dimension_numbers = #tpu.dot_dimension_numbers<[1], [0], [0], [1], [0, 0, 1, 1], [], []>} : vector<16x72xf32>, vector<72x64xf32>, vector<16x64xf32> -> vector<16x64xf32>
    %49 = arith.addf %44, %48 : vector<16x64xf32>
    %c0_52 = arith.constant 0 : index
    %c0_53 = arith.constant 0 : index
    %50 = vector.load %arg3[%c0_52, %c0_53] : memref<1x64xf32, #tpu.memory_space<vmem>>, vector<1x64xf32>
    %51 = vector.broadcast %50 : vector<1x64xf32> to vector<16x64xf32>
    %52 = arith.addf %49, %51 : vector<16x64xf32>
    %cst_54 = arith.constant 0.000000e+00 : f32
    %53 = vector.broadcast %cst_54 : f32 to vector<16x64xf32>
    %54 = arith.cmpf oge, %52, %53 : vector<16x64xf32>
    %cst_55 = arith.constant 2.000000e-01 : f32
    %55 = vector.broadcast %cst_55 : f32 to vector<16x64xf32>
    %56 = arith.mulf %55, %52 : vector<16x64xf32>
    %57 = arith.select %54, %52, %56 : vector<16x64xi1>, vector<16x64xf32>
    %cst_56 = arith.constant -2.560000e+02 : f32
    %cst_57 = arith.constant 2.560000e+02 : f32
    %58 = vector.broadcast %cst_56 : f32 to vector<16x64xf32>
    %59 = arith.maximumf %58, %57 : vector<16x64xf32>
    %60 = vector.broadcast %cst_57 : f32 to vector<16x64xf32>
    %61 = arith.minimumf %60, %59 : vector<16x64xf32>
    %c16_58 = arith.constant 16 : index
    %c0_59 = arith.constant 0 : index
    %62 = vector.load %arg7[%c16_58, %c0_59] : memref<32x64xf32, #tpu.memory_space<vmem>>, vector<16x64xf32>
    tpu.vector_store %arg7[%c16_58, %c0_59], %61 {strides = array<i32>} : memref<32x64xf32, #tpu.memory_space<vmem>>, vector<16x64xf32>,
    %c22 = arith.constant 22 : index
    %c0_60 = arith.constant 0 : index
    %63 = vector.load %arg10[%c22, %c0_60] : memref<40x80xf32, #tpu.memory_space<vmem>>, vector<16x64xf32>
    tpu.vector_store %arg10[%c22, %c0_60], %61 {strides = array<i32>} : memref<40x80xf32, #tpu.memory_space<vmem>>, vector<16x64xf32>,
    %c0_61 = arith.constant 0 : index
    %c0_62 = arith.constant 0 : index
    %64 = vector.load %arg4[%c0_61, %c0_62] : memref<96x40xf32, #tpu.memory_space<vmem>>, vector<96x40xf32>
    %c0_63 = arith.constant 0 : index
    %c0_64 = arith.constant 0 : index
    %65 = vector.load %arg10[%c0_63, %c0_64] : memref<40x80xf32, #tpu.memory_space<vmem>>, vector<40x80xf32>
    %cst_65 = arith.constant dense<0.000000e+00> : vector<96x80xf32>
    %66 = tpu.matmul %64, %65, %cst_65 {dimension_numbers = #tpu.dot_dimension_numbers<[1], [0], [0], [1], [0, 0, 1, 1], [], []>} : vector<96x40xf32>, vector<40x80xf32>, vector<96x80xf32> -> vector<96x80xf32>
    %67 = vector.extract_strided_slice %66 {offsets = [0, 0], sizes = [16, 80], strides = [1, 1]} : vector<96x80xf32> to vector<16x80xf32>
    %c0_66 = arith.constant 0 : index
    %c0_67 = arith.constant 0 : index
    %c0_68 = arith.constant 0 : index
    %68 = vector.load %arg5[%c0_66, %c0_67, %c0_68] : memref<6x80x64xf32, #tpu.memory_space<vmem>>, vector<1x80x64xf32>
    %69 = vector.shape_cast %68 : vector<1x80x64xf32> to vector<80x64xf32>
    %cst_69 = arith.constant dense<0.000000e+00> : vector<16x64xf32>
    %70 = tpu.matmul %67, %69, %cst_69 {dimension_numbers = #tpu.dot_dimension_numbers<[1], [0], [0], [1], [0, 0, 1, 1], [], []>} : vector<16x80xf32>, vector<80x64xf32>, vector<16x64xf32> -> vector<16x64xf32>
    %71 = vector.extract_strided_slice %66 {offsets = [16, 0], sizes = [16, 80], strides = [1, 1]} : vector<96x80xf32> to vector<16x80xf32>
    %c1_70 = arith.constant 1 : index
    %c0_71 = arith.constant 0 : index
    %c0_72 = arith.constant 0 : index
    %72 = vector.load %arg5[%c1_70, %c0_71, %c0_72] : memref<6x80x64xf32, #tpu.memory_space<vmem>>, vector<1x80x64xf32>
    %73 = vector.shape_cast %72 : vector<1x80x64xf32> to vector<80x64xf32>
    %cst_73 = arith.constant dense<0.000000e+00> : vector<16x64xf32>
    %74 = tpu.matmul %71, %73, %cst_73 {dimension_numbers = #tpu.dot_dimension_numbers<[1], [0], [0], [1], [0, 0, 1, 1], [], []>} : vector<16x80xf32>, vector<80x64xf32>, vector<16x64xf32> -> vector<16x64xf32>
    %75 = arith.addf %70, %74 : vector<16x64xf32>
    %76 = vector.extract_strided_slice %66 {offsets = [32, 0], sizes = [16, 80], strides = [1, 1]} : vector<96x80xf32> to vector<16x80xf32>
    %c2_74 = arith.constant 2 : index
    %c0_75 = arith.constant 0 : index
    %c0_76 = arith.constant 0 : index
    %77 = vector.load %arg5[%c2_74, %c0_75, %c0_76] : memref<6x80x64xf32, #tpu.memory_space<vmem>>, vector<1x80x64xf32>
    %78 = vector.shape_cast %77 : vector<1x80x64xf32> to vector<80x64xf32>
    %cst_77 = arith.constant dense<0.000000e+00> : vector<16x64xf32>
    %79 = tpu.matmul %76, %78, %cst_77 {dimension_numbers = #tpu.dot_dimension_numbers<[1], [0], [0], [1], [0, 0, 1, 1], [], []>} : vector<16x80xf32>, vector<80x64xf32>, vector<16x64xf32> -> vector<16x64xf32>
    %80 = arith.addf %75, %79 : vector<16x64xf32>
    %81 = vector.extract_strided_slice %66 {offsets = [48, 0], sizes = [16, 80], strides = [1, 1]} : vector<96x80xf32> to vector<16x80xf32>
    %c3 = arith.constant 3 : index
    %c0_78 = arith.constant 0 : index
    %c0_79 = arith.constant 0 : index
    %82 = vector.load %arg5[%c3, %c0_78, %c0_79] : memref<6x80x64xf32, #tpu.memory_space<vmem>>, vector<1x80x64xf32>
    %83 = vector.shape_cast %82 : vector<1x80x64xf32> to vector<80x64xf32>
    %cst_80 = arith.constant dense<0.000000e+00> : vector<16x64xf32>
    %84 = tpu.matmul %81, %83, %cst_80 {dimension_numbers = #tpu.dot_dimension_numbers<[1], [0], [0], [1], [0, 0, 1, 1], [], []>} : vector<16x80xf32>, vector<80x64xf32>, vector<16x64xf32> -> vector<16x64xf32>
    %85 = arith.addf %80, %84 : vector<16x64xf32>
    %86 = vector.extract_strided_slice %66 {offsets = [64, 0], sizes = [16, 80], strides = [1, 1]} : vector<96x80xf32> to vector<16x80xf32>
    %c4 = arith.constant 4 : index
    %c0_81 = arith.constant 0 : index
    %c0_82 = arith.constant 0 : index
    %87 = vector.load %arg5[%c4, %c0_81, %c0_82] : memref<6x80x64xf32, #tpu.memory_space<vmem>>, vector<1x80x64xf32>
    %88 = vector.shape_cast %87 : vector<1x80x64xf32> to vector<80x64xf32>
    %cst_83 = arith.constant dense<0.000000e+00> : vector<16x64xf32>
    %89 = tpu.matmul %86, %88, %cst_83 {dimension_numbers = #tpu.dot_dimension_numbers<[1], [0], [0], [1], [0, 0, 1, 1], [], []>} : vector<16x80xf32>, vector<80x64xf32>, vector<16x64xf32> -> vector<16x64xf32>
    %90 = arith.addf %85, %89 : vector<16x64xf32>
    %91 = vector.extract_strided_slice %66 {offsets = [80, 0], sizes = [16, 80], strides = [1, 1]} : vector<96x80xf32> to vector<16x80xf32>
    %c5 = arith.constant 5 : index
    %c0_84 = arith.constant 0 : index
    %c0_85 = arith.constant 0 : index
    %92 = vector.load %arg5[%c5, %c0_84, %c0_85] : memref<6x80x64xf32, #tpu.memory_space<vmem>>, vector<1x80x64xf32>
    %93 = vector.shape_cast %92 : vector<1x80x64xf32> to vector<80x64xf32>
    %cst_86 = arith.constant dense<0.000000e+00> : vector<16x64xf32>
    %94 = tpu.matmul %91, %93, %cst_86 {dimension_numbers = #tpu.dot_dimension_numbers<[1], [0], [0], [1], [0, 0, 1, 1], [], []>} : vector<16x80xf32>, vector<80x64xf32>, vector<16x64xf32> -> vector<16x64xf32>
    %95 = arith.addf %90, %94 : vector<16x64xf32>
    %c0_87 = arith.constant 0 : index
    %c0_88 = arith.constant 0 : index
    %96 = vector.load %arg6[%c0_87, %c0_88] : memref<1x64xf32, #tpu.memory_space<vmem>>, vector<1x64xf32>
    %97 = vector.broadcast %96 : vector<1x64xf32> to vector<16x64xf32>
    %98 = arith.addf %95, %97 : vector<16x64xf32>
    %cst_89 = arith.constant 0.000000e+00 : f32
    %99 = vector.broadcast %cst_89 : f32 to vector<16x64xf32>
    %100 = arith.cmpf oge, %98, %99 : vector<16x64xf32>
    %cst_90 = arith.constant 2.000000e-01 : f32
    %101 = vector.broadcast %cst_90 : f32 to vector<16x64xf32>
    %102 = arith.mulf %101, %98 : vector<16x64xf32>
    %103 = arith.select %100, %98, %102 : vector<16x64xi1>, vector<16x64xf32>
    %cst_91 = arith.constant -2.560000e+02 : f32
    %cst_92 = arith.constant 2.560000e+02 : f32
    %104 = vector.broadcast %cst_91 : f32 to vector<16x64xf32>
    %105 = arith.maximumf %104, %103 : vector<16x64xf32>
    %106 = vector.broadcast %cst_92 : f32 to vector<16x64xf32>
    %107 = arith.minimumf %106, %105 : vector<16x64xf32>
    %c0_93 = arith.constant 0 : index
    %c0_94 = arith.constant 0 : index
    %108 = vector.load %arg8[%c0_93, %c0_94] : memref<16x64xf32, #tpu.memory_space<vmem>>, vector<16x64xf32>
    tpu.vector_store %arg8[%c0_93, %c0_94], %107 {strides = array<i32>} : memref<16x64xf32, #tpu.memory_space<vmem>>, vector<16x64xf32>,
    return
  }
  func.func @transform_0(%arg0: i32) -> (i32, i32) {
    %c0_i32 = arith.constant 0 : i32
    %c0_i32_0 = arith.constant 0 : i32
    return %arg0, %c0_i32 : i32, i32
  }
  func.func @transform_1(%arg0: i32) -> (i32, i32, i32) {
    %c0_i32 = arith.constant 0 : i32
    %c0_i32_0 = arith.constant 0 : i32
    %c0_i32_1 = arith.constant 0 : i32
    %c0_i32_2 = arith.constant 0 : i32
    return %c0_i32, %c0_i32_0, %c0_i32_1 : i32, i32, i32
  }
  func.func @transform_2(%arg0: i32) -> (i32, i32) {
    %c0_i32 = arith.constant 0 : i32
    %c0_i32_0 = arith.constant 0 : i32
    %c0_i32_1 = arith.constant 0 : i32
    return %c0_i32, %c0_i32_0 : i32, i32
  }
  func.func @transform_3(%arg0: i32) -> (i32, i32) {
    %c0_i32 = arith.constant 0 : i32
    %c0_i32_0 = arith.constant 0 : i32
    %c0_i32_1 = arith.constant 0 : i32
    return %c0_i32, %c0_i32_0 : i32, i32
  }
  func.func @transform_4(%arg0: i32) -> (i32, i32, i32) {
    %c0_i32 = arith.constant 0 : i32
    %c0_i32_0 = arith.constant 0 : i32
    %c0_i32_1 = arith.constant 0 : i32
    %c0_i32_2 = arith.constant 0 : i32
    return %c0_i32, %c0_i32_0, %c0_i32_1 : i32, i32, i32
  }
  func.func @transform_5(%arg0: i32) -> (i32, i32) {
    %c0_i32 = arith.constant 0 : i32
    %c0_i32_0 = arith.constant 0 : i32
    %c0_i32_1 = arith.constant 0 : i32
    return %c0_i32, %c0_i32_0 : i32, i32
  }
  func.func @transform_6(%arg0: i32) -> (i32, i32) {
    %c0_i32 = arith.constant 0 : i32
    %c0_i32_0 = arith.constant 0 : i32
    return %arg0, %c0_i32 : i32, i32
  }
  func.func @transform_7(%arg0: i32) -> (i32, i32) {
    %c0_i32 = arith.constant 0 : i32
    %c0_i32_0 = arith.constant 0 : i32
    return %arg0, %c0_i32 : i32, i32
  }
}

</mosaic_0001>

<bundles_post_ra>
// kernel: tile.13
= control target key start
LH: loop header
LB: loop body
LE: loop exit
PB: predicated region body
PF: predicated region fallthrough
CT: control target
= control target key end

     0   :  { %s28_s0 = inlined_call_operand.vmem [shape: f32[4], index: 0, kind: input, shape index: {}]   ;;  %s29_s1 = inlined_call_operand.vmem [shape: f32[16,4], index: 1, kind: output, shape index: {}]  }
   0x1   :  { %v4_v0 = vld [vmem:[%s28_s0] ss:$0 sm:$0xff] }
   0x2   :  { %5 = vst [vmem:[%s29_s1] sm:$0xff] %v4_v0 }
   0x3   :  { %8 = vst [vmem:[%s29_s1 + $0x8] sm:$0xff] %v4_v0 }

// kernel: tile.14
= control target key start
LH: loop header
LB: loop body
LE: loop exit
PB: predicated region body
PF: predicated region fallthrough
CT: control target
= control target key end

     0   :  { %s131_s10 = smov 60   ;;  %s132_s11 = smov 52   ;;  %vm3_vm0 = vcmask 31744   ;;  %vm9_vm1 = vcmask 523744   ;;  %vm15_vm2 = vcmask 490944   ;;  %vm21_vm3 = vcmask 458144   ;;  %s207_s0 = inlined_call_operand.vmem [shape: f32[16,4], index: 0, kind: input, shape index: {}]   ;;  %s208_s1 = inlined_call_operand.vmem [shape: f32[1,64], index: 1, kind: output, shape index: {}]  }
   0x1   :  { %v101_v0 = vld [vmem:[%s207_s0 + $0xf] sm:$0x1]   ;;  %v103_v1 = vld [vmem:[%s207_s0 + $0xd] sm:$0x1]   ;;  %v105_v2 = vld [vmem:[%s207_s0 + $0xb] sm:$0x1]  }
   0x2   :  { %7 = vrot.lane.b32.xlu0 %v101_v0, %s131_s10  ;;  %19 = vrot.lane.b32.xlu1 %v103_v1, %s132_s11  ;;  %s133_s14 = smov 44   ;;  %v102_v3 = vld [vmem:[%s207_s0 + $0xe] sm:$0x1]   ;;  %v104_v4 = vld [vmem:[%s207_s0 + $0xc] sm:$0x1]   ;;  %s134_s19 = smov 56  }
   0x3   :  { %31 = vrot.lane.b32.xlu2 %v105_v2, %s133_s14  ;;  %s135_s20 = smov 48   ;;  %v106_v5 = vld [vmem:[%s207_s0 + $0xa] sm:$0x1]   ;;  %s136_s23 = smov 40   ;;  %v107_v6 = vld [vmem:[%s207_s0 + $0x9] sm:$0x1]  }
   0x4   :  { %v108_v7 = vld [vmem:[%s207_s0 + $0x8] sm:$0x1]   ;;  %s137_s28 = smov 36   ;;  %s138_s29 = smov 32   ;;  %v109_v8 = vld [vmem:[%s207_s0 + $0x7] sm:$0x1]  }
   0x5   :  { %s139_s3 = smov 28   ;;  %v110_v9 = vld [vmem:[%s207_s0 + $0x6] sm:$0x1]   ;;  %v111_v10 = vld [vmem:[%s207_s0 + $0x5] sm:$0x1]   ;;  %s140_s8 = smov 24  }
   0x6   :  { %s141_s9 = smov 20   ;;  %v112_v11 = vld [vmem:[%s207_s0 + $0x4] sm:$0x1]   ;;  %s142_s12 = smov 16   ;;  %v113_v12 = vld [vmem:[%s207_s0 + $0x3] sm:$0x1]  }
   0x7   :  { %v114_v13 = vld [vmem:[%s207_s0 + $0x2] sm:$0x1]   ;;  %s143_s17 = smov 12   ;;  %s144_s18 = smov 8   ;;  %v115_v14 = vld [vmem:[%s207_s0 + $0x1] sm:$0x1]  }
   0x8   :  { %s145_s21 = smov 4   ;;  %v2_v15 = vld [vmem:[%s207_s0] sm:$0x1]   ;;  %vm27_vm4 = vcmask 425344   ;;  %vm33_vm5 = vcmask 392544   ;;  %vm39_vm6 = vcmask 359744  }
   0x9   :  { %4 = vst.msk [vmem:[#allocation0] sm:$0x1] %vm3_vm0, %v2_v15   ;;  %vm45_vm7 = vcmask 326944   ;;  %vm51_vm8 = vcmask 294144   ;;  %vm57_vm9 = vcmask 261344   ;;  %vm63_vm10 = vcmask 228544  }
   0xa   :  { %13 = vrot.lane.b32.xlu0 %v102_v3, %s134_s19  ;;  %25 = vrot.lane.b32.xlu1 %v104_v4, %s135_s20  ;;  %vm69_vm11 = vcmask 195744   ;;  %vm75_vm12 = vcmask 162944   ;;  %vm81_vm13 = vcmask 130144   ;;  %vm87_vm14 = vcmask 97344  }
   0xb   :  { %37 = vrot.lane.b32.xlu2 %v106_v5, %s136_s23  ;;  %vm93_vm15 = vcmask 64544  }
  0x12   :  { %43 = vrot.lane.b32.xlu0 %v107_v6, %s137_s28  ;;  %49 = vrot.lane.b32.xlu1 %v108_v7, %s138_s29 }
  0x13   :  { %55 = vrot.lane.b32.xlu2 %v109_v8, %s139_s3 }
  0x1a   :  { %61 = vrot.lane.b32.xlu0 %v110_v9, %s140_s8  ;;  %67 = vrot.lane.b32.xlu1 %v111_v10, %s141_s9 }
  0x1b   :  { %73 = vrot.lane.b32.xlu2 %v112_v11, %s142_s12 }
  0x22   :  { %79 = vrot.lane.b32.xlu0 %v113_v12, %s143_s17  ;;  %85 = vrot.lane.b32.xlu1 %v114_v13, %s144_s18 }
  0x23   :  { %91 = vrot.lane.b32.xlu2 %v115_v14, %s145_s21 }
  0x5d   :  { %v32_v16 = vpop.permute.xlu2 %31  }
  0x65   :  { %v38_v17 = vpop.permute.xlu2 %37  }
  0x6d   :  { %v56_v18 = vpop.permute.xlu2 %55  }
  0x74   :  { %v8_v19 = vpop.permute.xlu0 %7   ;;  %v20_v20 = vpop.permute.xlu1 %19  }
  0x75   :  { %10 = vst.msk [vmem:[#allocation0] sm:$0x1] %vm9_vm1, %v8_v19   ;;  %v74_v21 = vpop.permute.xlu2 %73  }
  0x7c   :  { %v14_v22 = vpop.permute.xlu0 %13   ;;  %v26_v23 = vpop.permute.xlu1 %25  }
  0x7d   :  { %16 = vst.msk [vmem:[#allocation0] sm:$0x1] %vm15_vm2, %v14_v22   ;;  %v92_v24 = vpop.permute.xlu2 %91  }
  0x7e   :  { %22 = vst.msk [vmem:[#allocation0] sm:$0x1] %vm21_vm3, %v20_v20  }
  0x7f   :  { %28 = vst.msk [vmem:[#allocation0] sm:$0x1] %vm27_vm4, %v26_v23  }
  0x80   :  { %34 = vst.msk [vmem:[#allocation0] sm:$0x1] %vm33_vm5, %v32_v16  }
  0x81   :  { %40 = vst.msk [vmem:[#allocation0] sm:$0x1] %vm39_vm6, %v38_v17  }
  0x84   :  { %v44_v25 = vpop.permute.xlu0 %43   ;;  %v50_v26 = vpop.permute.xlu1 %49  }
  0x85   :  { %46 = vst.msk [vmem:[#allocation0] sm:$0x1] %vm45_vm7, %v44_v25  }
  0x86   :  { %52 = vst.msk [vmem:[#allocation0] sm:$0x1] %vm51_vm8, %v50_v26  }
  0x87   :  { %58 = vst.msk [vmem:[#allocation0] sm:$0x1] %vm57_vm9, %v56_v18  }
  0x8c   :  { %v62_v27 = vpop.permute.xlu0 %61   ;;  %v68_v28 = vpop.permute.xlu1 %67  }
  0x8d   :  { %64 = vst.msk [vmem:[#allocation0] sm:$0x1] %vm63_vm10, %v62_v27  }
  0x8e   :  { %70 = vst.msk [vmem:[#allocation0] sm:$0x1] %vm69_vm11, %v68_v28  }
  0x8f   :  { %76 = vst.msk [vmem:[#allocation0] sm:$0x1] %vm75_vm12, %v74_v21  }
  0x94   :  { %v80_v29 = vpop.permute.xlu0 %79   ;;  %v86_v30 = vpop.permute.xlu1 %85  }
  0x95   :  { %82 = vst.msk [vmem:[#allocation0] sm:$0x1] %vm81_vm13, %v80_v29  }
  0x96   :  { %88 = vst.msk [vmem:[#allocation0] sm:$0x1] %vm87_vm14, %v86_v30  }
  0x97   :  { %94 = vst.msk [vmem:[#allocation0] sm:$0x1] %vm93_vm15, %v92_v24  }
  0x9e   :  { %v97_v31 = vld [vmem:[#allocation0] sm:$0x1] }
  0x9f   :  { %100 = vst [vmem:[%s208_s1] sm:$0x1] %v97_v31 }

// kernel: tile.18
= control target key start
LH: loop header
LB: loop body
LE: loop exit
PB: predicated region body
PF: predicated region fallthrough
CT: control target
= control target key end

     0   :  { %s22_s0 = inlined_call_operand.vmem [shape: f32[8], index: 0, kind: input, shape index: {}]   ;;  %s23_s1 = inlined_call_operand.vmem [shape: f32[8,8], index: 1, kind: output, shape index: {}]  }
   0x1   :  { %v4_v0 = vld [vmem:[%s22_s0] ss:$0 sm:$0xff] }
   0x2   :  { %5 = vst [vmem:[%s23_s1] sm:$0xff] %v4_v0 }

// kernel: tile.19
= control target key start
LH: loop header
LB: loop body
LE: loop exit
PB: predicated region body
PF: predicated region fallthrough
CT: control target
= control target key end

     0   :  { %s67_s10 = smov 56   ;;  %s68_s11 = smov 40   ;;  %vm3_vm0 = vcmask 64512   ;;  %vm9_vm1 = vcmask 523712   ;;  %vm15_vm2 = vcmask 458112   ;;  %vm21_vm3 = vcmask 392512   ;;  %s111_s0 = inlined_call_operand.vmem [shape: f32[8,8], index: 0, kind: input, shape index: {}]   ;;  %s112_s1 = inlined_call_operand.vmem [shape: f32[1,64], index: 1, kind: output, shape index: {}]  }
   0x1   :  { %v53_v0 = vld [vmem:[%s111_s0 + $0x7] sm:$0x1]   ;;  %v55_v1 = vld [vmem:[%s111_s0 + $0x5] sm:$0x1]   ;;  %v57_v2 = vld [vmem:[%s111_s0 + $0x3] sm:$0x1]  }
   0x2   :  { %7 = vrot.lane.b32.xlu0 %v53_v0, %s67_s10  ;;  %19 = vrot.lane.b32.xlu1 %v55_v1, %s68_s11  ;;  %s69_s14 = smov 24   ;;  %v54_v3 = vld [vmem:[%s111_s0 + $0x6] sm:$0x1]   ;;  %v56_v4 = vld [vmem:[%s111_s0 + $0x4] sm:$0x1]   ;;  %s70_s21 = smov 48  }
   0x3   :  { %31 = vrot.lane.b32.xlu2 %v57_v2, %s69_s14  ;;  %v58_v5 = vld [vmem:[%s111_s0 + $0x2] sm:$0x1]   ;;  %s71_s22 = smov 32   ;;  %s72_s23 = smov 16   ;;  %v59_v6 = vld [vmem:[%s111_s0 + $0x1] sm:$0x1]  }
   0x4   :  { %s73_s26 = smov 8   ;;  %v2_v7 = vld [vmem:[%s111_s0] sm:$0x1]   ;;  %vm27_vm4 = vcmask 326912   ;;  %vm33_vm5 = vcmask 261312   ;;  %vm39_vm6 = vcmask 195712  }
   0x5   :  { %4 = vst.msk [vmem:[#allocation0] sm:$0x1] %vm3_vm0, %v2_v7   ;;  %vm45_vm7 = vcmask 130112  }
   0xa   :  { %13 = vrot.lane.b32.xlu0 %v54_v3, %s70_s21  ;;  %25 = vrot.lane.b32.xlu1 %v56_v4, %s71_s22 }
   0xb   :  { %37 = vrot.lane.b32.xlu2 %v58_v5, %s72_s23 }
  0x12   :  { %43 = vrot.lane.b32.xlu0 %v59_v6, %s73_s26 }
  0x5d   :  { %v32_v8 = vpop.permute.xlu2 %31  }
  0x65   :  { %v38_v9 = vpop.permute.xlu2 %37  }
  0x74   :  { %v8_v10 = vpop.permute.xlu0 %7   ;;  %v20_v11 = vpop.permute.xlu1 %19  }
  0x75   :  { %10 = vst.msk [vmem:[#allocation0] sm:$0x1] %vm9_vm1, %v8_v10  }
  0x7c   :  { %v14_v12 = vpop.permute.xlu0 %13   ;;  %v26_v13 = vpop.permute.xlu1 %25  }
  0x7d   :  { %16 = vst.msk [vmem:[#allocation0] sm:$0x1] %vm15_vm2, %v14_v12  }
  0x7e   :  { %22 = vst.msk [vmem:[#allocation0] sm:$0x1] %vm21_vm3, %v20_v11  }
  0x7f   :  { %28 = vst.msk [vmem:[#allocation0] sm:$0x1] %vm27_vm4, %v26_v13  }
  0x80   :  { %34 = vst.msk [vmem:[#allocation0] sm:$0x1] %vm33_vm5, %v32_v8  }
  0x81   :  { %40 = vst.msk [vmem:[#allocation0] sm:$0x1] %vm39_vm6, %v38_v9  }
  0x84   :  { %v44_v14 = vpop.permute.xlu0 %43  }
  0x85   :  { %46 = vst.msk [vmem:[#allocation0] sm:$0x1] %vm45_vm7, %v44_v14  }
  0x8c   :  { %v49_v15 = vld [vmem:[#allocation0] sm:$0x1] }
  0x8d   :  { %52 = vst [vmem:[%s112_s1] sm:$0x1] %v49_v15 }

// kernel: _lambda_.1
= control target key start
LH: loop header
LB: loop body
LE: loop exit
PB: predicated region body
PF: predicated region fallthrough
CT: control target
= control target key end

     0   :  { %vm25_vm0 = vcmask 588800   ;;  %v850_v3 = vmov 0.0   ;;  %vm30_vm1 = vcmask 584704   ;;  %vm40_vm2 = vcmask 523264   ;;  %s1340_s1 = inlined_call_operand.vmem [shape: f32[3,72,64], index: 1, kind: input, shape index: {}]   ;;  %s1341_s0 = inlined_call_operand.vmem [shape: f32[32,64], index: 0, kind: input, shape index: {}]   ;;  %s1342_s2 = inlined_call_operand.vmem [shape: f32[1,64], index: 2, kind: input, shape index: {}]   ;;  %s1343_s6 = inlined_call_operand.vmem [shape: f32[32,64], index: 6, kind: output, shape index: {0}]   ;;  %s1344_s3 = inlined_call_operand.vmem [shape: f32[96,40], index: 3, kind: input, shape index: {}]   ;;  %s1345_s4 = inlined_call_operand.vmem [shape: f32[6,80,64], index: 4, kind: input, shape index: {}]   ;;  %s1346_s5 = inlined_call_operand.vmem [shape: f32[1,64], index: 5, kind: input, shape index: {}]   ;;  %s1347_s7 = inlined_call_operand.vmem [shape: f32[16,64], index: 7, kind: output, shape index: {1}]  }
   0x1   :  { %v721_v0 = vld [vmem:[%s1340_s1 + $0x88] sm:$0xff]  ;;  %v897_v1 = vld [vmem:[%s1340_s1 + $0xd0] sm:$0xff]  ;;  %v902_v2 = vld [vmem:[%s1340_s1 + $0x40] sm:$0xff]  ;;  %26 = vst.msk [vmem:[#allocation2] sm:$0xff] %vm25_vm0, %v850_v3  ;;  %vm32_vm3 = vcmask 654336   ;;  %vm350_vm8 = vcmask 326656  }
   0x2   :  { %83 = vmatpush.msra.mxu0 %v721_v0  ;;  %153 = vmatpush.msra.mxu2 %v897_v1  ;;  %v720_v4 = vld [vmem:[%s1340_s1 + $0x80] sm:$0xff]  ;;  %v913_v5 = vld [vmem:[%s1340_s1 + $0xc8] sm:$0xff]  ;;  %v918_v6 = vld [vmem:[%s1340_s1 + $0x38] sm:$0xff]  ;;  %27 = vst.msk [vmem:[#allocation2 + $0x8] sm:$0xff] %vm25_vm0, %v850_v3 }
   0x3   :  { %112 = vmatpush.msra.mxu1 %v902_v2  ;;  %v719_v7 = vld [vmem:[%s1340_s1 + $0x78] sm:$0xff]  ;;  %v929_v8 = vld [vmem:[%s1340_s1 + $0xc0] sm:$0xff]  ;;  %226 = vmatpush.msra.mxu3 %v721_v0  ;;  %28 = vst.msk [vmem:[#allocation2 + $0x10] sm:$0xff] %vm25_vm0, %v850_v3  ;;  %v937_v9 = vld [vmem:[%s1340_s1 + $0x30] sm:$0xff] }
   0x4   :  { %84 = vmatpush.msra.mxu0 %v720_v4  ;;  %154 = vmatpush.msra.mxu2 %v913_v5  ;;  %29 = vst.msk [vmem:[#allocation2 + $0x18] sm:$0xff] %vm25_vm0, %v850_v3  ;;  %v718_v10 = vld [vmem:[%s1340_s1 + $0x70] sm:$0xff]  ;;  %v948_v11 = vld [vmem:[%s1340_s1 + $0xb8] sm:$0xff]  ;;  %v955_v12 = vld [vmem:[%s1340_s1 + $0x28] sm:$0xff] }
   0x5   :  { %113 = vmatpush.msra.mxu1 %v918_v6  ;;  %227 = vmatpush.msra.mxu3 %v720_v4  ;;  %31 = vst.msk [vmem:[#allocation2 + $0x20] sm:$0xf] %vm30_vm1, %v850_v3  ;;  %v717_v13 = vld [vmem:[%s1340_s1 + $0x68] sm:$0xff]  ;;  %v964_v14 = vld [vmem:[%s1340_s1 + $0xb0] sm:$0xff]  ;;  %v53_v15 = vld [vmem:[%s1340_s1 + $0x20] sm:$0xff] }
   0x6   :  { %85 = vmatpush.msra.mxu0 %v719_v7  ;;  %155 = vmatpush.msra.mxu2 %v929_v8  ;;  %v716_v16 = vld [vmem:[%s1340_s1 + $0x60] sm:$0xff]  ;;  %v977_v17 = vld [vmem:[%s1340_s1 + $0xa8] sm:$0xff]  ;;  %v982_v18 = vld [vmem:[%s1340_s1 + $0x18] sm:$0xff]  ;;  %33 = vst.msk [vmem:[#allocation3] sm:$0xff] %vm32_vm3, %v850_v3 }
   0x7   :  { %114 = vmatpush.msra.mxu1 %v937_v9  ;;  %228 = vmatpush.msra.mxu3 %v719_v7  ;;  %v38_v19 = vld [vmem:[%s1341_s0] sm:$0xff]  ;;  %v39_v20 = vld [vmem:[%s1341_s0 + $0x8] sm:$0xff]  ;;  %v43_v21 = vld [vmem:[%s1341_s0 + $0x10] sm:$0xff]  ;;  %34 = vst.msk [vmem:[#allocation3 + $0x8] sm:$0xff] %vm32_vm3, %v850_v3 }
   0x8   :  { %86 = vmatpush.msra.mxu0 %v718_v10  ;;  %156 = vmatpush.msra.mxu2 %v948_v11  ;;  %v715_v22 = vld [vmem:[%s1340_s1 + $0x58] sm:$0xff]  ;;  %v728_v23 = vld [vmem:[%s1340_s1 + $0xa0] sm:$0xff]  ;;  %41 = vst.msk [vmem:[#allocation2 + $0x1] sm:$0xff] %vm40_vm2, %v38_v19  ;;  %v51_v25 = vld [vmem:[%s1340_s1 + $0x10] sm:$0xff] }
   0x9   :  { %115 = vmatpush.msra.mxu1 %v955_v12  ;;  %229 = vmatpush.msra.mxu3 %v718_v10  ;;  %v44_v24 = vld [vmem:[%s1341_s0 + $0x18] sm:$0xff]  ;;  %42 = vst.msk [vmem:[#allocation2 + $0x9] sm:$0xff] %vm40_vm2, %v39_v20  ;;  %v714_v26 = vld [vmem:[%s1340_s1 + $0x50] sm:$0xff]  ;;  %v50_v28 = vld [vmem:[%s1340_s1 + $0x8] sm:$0xff] }
   0xa   :  { %87 = vmatpush.msra.mxu0 %v717_v13  ;;  %157 = vmatpush.msra.mxu2 %v964_v14  ;;  %v727_v27 = vld [vmem:[%s1340_s1 + $0x98] sm:$0xff]  ;;  %45 = vst.msk [vmem:[#allocation2 + $0x13] sm:$0xff] %vm40_vm2, %v43_v21  ;;  %v713_v29 = vld [vmem:[%s1340_s1 + $0x48] sm:$0xff]  ;;  %v726_v30 = vld [vmem:[%s1340_s1 + $0x90] sm:$0xff] }
   0xb   :  { %116 = vmatpush.msra.mxu1 %v53_v15  ;;  %230 = vmatpush.msra.mxu3 %v717_v13  ;;  %46 = vst.msk [vmem:[#allocation2 + $0x1b] sm:$0xff] %vm40_vm2, %v44_v24  ;;  %v49_v31 = vld [vmem:[%s1340_s1] sm:$0xff]  ;;  %v334_v24 = vld [vmem:[%s1344_s3 + $0x8] sm:$0xff] }
   0xc   :  { %88 = vmatpush.msra.mxu0 %v716_v16  ;;  %158 = vmatpush.msra.mxu2 %v977_v17  ;;  %35 = vst.msk [vmem:[#allocation3 + $0x10] sm:$0xff] %vm32_vm3, %v850_v3  ;;  %v847_v47 = vld [vmem:[%s1342_s2] ss:$0 sm:$0xff] }
   0xd   :  { %117 = vmatpush.msra.mxu1 %v982_v18  ;;  %231 = vmatpush.msra.mxu3 %v716_v16  ;;  %36 = vst.msk [vmem:[#allocation3 + $0x18] sm:$0xff] %vm32_vm3, %v850_v3  ;;  %v848_v63 = vld [vmem:[%s1342_s2] ss:$0 sm:$0xff] }
   0xe   :  { %89 = vmatpush.msra.mxu0 %v715_v22  ;;  %159 = vmatpush.msra.mxu2 %v728_v23  ;;  %37 = vst.msk [vmem:[#allocation3 + $0x20] sm:$0xff] %vm32_vm3, %v850_v3 }
   0xf   :  { %118 = vmatpush.msra.mxu1 %v51_v25  ;;  %232 = vmatpush.msra.mxu3 %v715_v22  ;;  %v58_v32 = vld [vmem:[#allocation2 + $0x1] sm:$0xff] }
  0x10   :  { %90 = vmatpush.msra.mxu0 %v714_v26  ;;  %160 = vmatpush.msra.mxu2 %v727_v27  ;;  %v47_v33 = vld [vmem:[#allocation2] sm:$0xff]  ;;  %v129_v36 = vld [vmem:[#allocation2 + $0xa] sm:$0xff] }
  0x11   :  { %119 = vmatpush.msra.mxu1 %v50_v28  ;;  %233 = vmatpush.msra.mxu3 %v714_v26  ;;  %v128_v34 = vld [vmem:[#allocation2 + $0x2] sm:$0xff]  ;;  %v202_v35 = vld [vmem:[#allocation2 + $0x13] sm:$0xff] }
  0x12   :  { %91 = vmatpush.msra.mxu0 %v713_v29  ;;  %161 = vmatpush.msra.mxu2 %v726_v30  ;;  %v59_v37 = vld [vmem:[#allocation2 + $0x9] sm:$0xff]  ;;  %v203_v39 = vld [vmem:[#allocation2 + $0x1b] sm:$0xff]  ;;  %v191_v40 = vld [vmem:[#allocation2 + $0x12] sm:$0xff] }
  0x13   :  { %120 = vmatpush.msra.mxu1 %v49_v31  ;;  %735 = vmatmul.msk.f32.vlgmr.msra.gmra.mxu2 %vm25_vm0, %v128_v34  ;;  %v48_v38 = vld [vmem:[#allocation2 + $0x8] sm:$0xff]  ;;  %v271_v41 = vld [vmem:[#allocation2 + $0x14] sm:$0xff]  ;;  %v272_v43 = vld [vmem:[#allocation2 + $0x1c] sm:$0xff] }
  0x14   :  { %255 = vmatpush.msrb.mxu0 %v902_v2  ;;  %724 = vmatmul.msk.f32.vlgmr.msra.gmra.mxu1 %vm25_vm0, %v47_v33  ;;  %v192_v42 = vld [vmem:[#allocation2 + $0x1a] sm:$0xff]  ;;  %v335_v26 = vld [vmem:[%s1344_s3 + $0x10] sm:$0xff] }
  0x15   :  { %722 = vmatmul.msk.f32.vlgmr.msra.gmra.mxu0 %vm25_vm0, %v58_v32  ;;  %295 = vmatpush.msrb.mxu1 %v897_v1  ;;  %v333_v22 = vld [vmem:[%s1344_s3] sm:$0xff]  ;;  %v447_v32 = vld [vmem:[%s1345_s4 + $0x38] sm:$0xff]  ;;  %v446_v34 = vld [vmem:[%s1345_s4 + $0x30] sm:$0xff] }
  0x16   :  { %256 = vmatpush.msrb.mxu0 %v918_v6  ;;  %234 = vmatpush.msra.mxu3 %v713_v29  ;;  %v343_v29 = vld [vmem:[%s1344_s3 + $0x50] sm:$0xff]  ;;  %v786_v33 = vld [vmem:[%s1345_s4 + $0x98] sm:$0xff] }
  0x17   :  { %748 = vmatmul.msk.f32.vlgmr.msra.gmra.mxu3 %vm25_vm0, %v202_v35  ;;  %296 = vmatpush.msrb.mxu1 %v913_v5  ;;  %v337_v35 = vld [vmem:[%s1344_s3 + $0x20] sm:$0xff] }
  0x18   :  { %257 = vmatpush.msrb.mxu0 %v937_v9 }
  0x19   :  { %297 = vmatpush.msrb.mxu1 %v929_v8 }
  0x1a   :  { %258 = vmatpush.msrb.mxu0 %v955_v12 }
  0x1b   :  { %736 = vmatmul.msk.f32.gmra.mxu2 %vm25_vm0, %v129_v36  ;;  %298 = vmatpush.msrb.mxu1 %v948_v11  ;;  %v344_v36 = vld [vmem:[%s1344_s3 + $0x58] sm:$0xff] }
  0x1c   :  { %259 = vmatpush.msrb.mxu0 %v53_v15  ;;  %725 = vmatmul.msk.f32.gmra.mxu1 %vm25_vm0, %v48_v38  ;;  %v444_v38 = vld [vmem:[%s1345_s4 + $0x20] sm:$0xff] }
  0x1d   :  { %723 = vmatmul.msk.f32.gmra.mxu0 %vm25_vm0, %v59_v37  ;;  %299 = vmatpush.msrb.mxu1 %v964_v14  ;;  %v445_v37 = vld [vmem:[%s1345_s4 + $0x28] sm:$0xff] }
  0x1e   :  { %260 = vmatpush.msrb.mxu0 %v982_v18 }
  0x1f   :  { %749 = vmatmul.msk.f32.gmra.mxu3 %vm25_vm0, %v203_v39  ;;  %300 = vmatpush.msrb.mxu1 %v977_v17  ;;  %v338_v39 = vld [vmem:[%s1344_s3 + $0x28] sm:$0xff] }
  0x20   :  { %261 = vmatpush.msrb.mxu0 %v51_v25  ;;  %v341_v25 = vld [vmem:[%s1344_s3 + $0x40] sm:$0xff] }
  0x21   :  { %301 = vmatpush.msrb.mxu1 %v728_v23 }
  0x22   :  { %262 = vmatpush.msrb.mxu0 %v50_v28  ;;  %v336_v28 = vld [vmem:[%s1344_s3 + $0x18] sm:$0xff] }
  0x23   :  { %302 = vmatpush.msrb.mxu1 %v727_v27  ;;  %v342_v27 = vld [vmem:[%s1344_s3 + $0x48] sm:$0xff] }
  0x24   :  { %263 = vmatpush.msrb.mxu0 %v49_v31  ;;  %v448_v31 = vld [vmem:[%s1345_s4 + $0x40] sm:$0xff] }
  0x25   :  { %750 = vmatmul.msk.f32.vlgmr.msrb.gmra.mxu0 %vm25_vm0, %v191_v40  ;;  %303 = vmatpush.msrb.mxu1 %v726_v30  ;;  %v449_v30 = vld [vmem:[%s1345_s4 + $0x48] sm:$0xff]  ;;  %v339_v40 = vld [vmem:[%s1344_s3 + $0x30] sm:$0xff] }
  0x26   :  { %761 = vmatmul.msk.f32.vlgmr.msrb.gmra.mxu1 %vm25_vm0, %v271_v41  ;;  %502 = vmatpush.msra.mxu0 %v449_v30  ;;  %v340_v41 = vld [vmem:[%s1344_s3 + $0x38] sm:$0xff]  ;;  %v831_v30 = vld [vmem:[%s1345_s4 + $0x1b0] sm:$0xff] }
  0x28   :  { %503 = vmatpush.msra.mxu0 %v448_v31  ;;  %v830_v31 = vld [vmem:[%s1345_s4 + $0x1a8] sm:$0xff] }
  0x2a   :  { %504 = vmatpush.msra.mxu0 %v447_v32  ;;  %v829_v32 = vld [vmem:[%s1345_s4 + $0x1a0] sm:$0xff] }
  0x2c   :  { %505 = vmatpush.msra.mxu0 %v446_v34  ;;  %v828_v34 = vld [vmem:[%s1345_s4 + $0x198] sm:$0xff] }
  0x2d   :  { %751 = vmatmul.msk.f32.gmra.mxu0 %vm25_vm0, %v192_v42  ;;  %v443_v42 = vld [vmem:[%s1345_s4 + $0x18] sm:$0xff] }
  0x2e   :  { %762 = vmatmul.msk.f32.gmra.mxu1 %vm25_vm0, %v272_v43  ;;  %506 = vmatpush.msra.mxu0 %v445_v37  ;;  %v442_v43 = vld [vmem:[%s1345_s4 + $0x10] sm:$0xff] }
  0x30   :  { %507 = vmatpush.msra.mxu0 %v444_v38 }
  0x32   :  { %508 = vmatpush.msra.mxu0 %v443_v42 }
  0x34   :  { %509 = vmatpush.msra.mxu0 %v442_v43 }
  0x91   :  { %v122_v45 = vpop.f32.mrf.mxu1 }
  0x92   :  { %v93_v44 = vpop.f32.mrf.mxu0 }
  0x93   :  { %v123_v46 = vadd.f32 %v122_v45, %v93_v44  ;;  %v441_v44 = vld [vmem:[%s1345_s4 + $0x8] sm:$0xff]  ;;  %v785_v45 = vld [vmem:[%s1345_s4 + $0x90] sm:$0xff] }
  0x94   :  { %510 = vmatpush.msra.mxu0 %v441_v44 }
  0x96   :  { %v163_v48 = vpop.f32.mrf.mxu2 }
  0x97   :  { %v169_v49 = vadd.f32 %v163_v48, %v123_v46  ;;  %v440_v46 = vld [vmem:[%s1345_s4] sm:$0xff] }
  0x98   :  { %511 = vmatpush.msra.mxu0 %v440_v46  ;;  %v783_v48 = vld [vmem:[%s1345_s4 + $0x80] sm:$0xff] }
  0x99   :  { %v175_v50 = vadd.f32 %v847_v47, %v169_v49  ;;  %v125_v52 = vpop.f32.mrf.mxu1  ;;  %v782_v49 = vld [vmem:[%s1345_s4 + $0x78] sm:$0xff] }
  0x9a   :  { %v96_v51 = vpop.f32.mrf.mxu0  ;;  %v236_v56 = vpop.f32.mrf.mxu3 }
  0x9b   :  { %vm177_vm4 = vcmp.ge.f32.partialorder %v175_v50, 0.0  ;;  %v179_v53 = vmul.f32 0.2, %v175_v50  ;;  %v126_v55 = vadd.f32 %v125_v52, %v96_v51  ;;  %v780_v51 = vld [vmem:[%s1345_s4 + $0x68] sm:$0xff]  ;;  %v779_v52 = vld [vmem:[%s1345_s4 + $0x60] sm:$0xff] }
  0x9d   :  { %v181_v54 = vsel %vm177_vm4, %v175_v50, %v179_v53  ;;  %v781_v50 = vld [vmem:[%s1345_s4 + $0x70] sm:$0xff]  ;;  %v800_v53 = vld [vmem:[%s1345_s4 + $0xe8] sm:$0xff] }
  0x9e   :  { %v737_v57 = vclamps-f32 %v181_v54, 256.0  ;;  %v166_v58 = vpop.f32.mrf.mxu2  ;;  %542 = vmatpush.msra.mxu1 %v800_v53  ;;  %v778_v54 = vld [vmem:[%s1345_s4 + $0x58] sm:$0xff] }
  0x9f   :  { %v170_v59 = vadd.f32 %v166_v58, %v126_v55  ;;  %v777_v55 = vld [vmem:[%s1345_s4 + $0x50] sm:$0xff] }
  0xa0   :  { %187 = vst.msk [vmem:[%s1343_s6] sm:$0xff] %vm40_vm2, %v737_v57  ;;  %v797_v58 = vld [vmem:[%s1345_s4 + $0xd0] sm:$0xff] }
  0xa1   :  { %189 = vst.msk [vmem:[#allocation3 + $0x2] sm:$0xff] %vm40_vm2, %v737_v57  ;;  %v176_v60 = vadd.f32 %v847_v47, %v170_v59  ;;  %v784_v47 = vld [vmem:[%s1345_s4 + $0x88] sm:$0xff]  ;;  %v798_v57 = vld [vmem:[%s1345_s4 + $0xd8] sm:$0xff] }
  0xa2   :  { %v265_v61 = vpop.f32.mrf.mxu0  ;;  %v239_v6 = vpop.f32.mrf.mxu3  ;;  %v796_v59 = vld [vmem:[%s1345_s4 + $0xc8] sm:$0xff] }
  0xa3   :  { %v266_v62 = vadd.f32 %v265_v61, %v236_v56  ;;  %vm178_vm5 = vcmp.ge.f32.partialorder %v176_v60, 0.0  ;;  %v180_v0 = vmul.f32 0.2, %v176_v60  ;;  %v305_v1 = vpop.f32.mrf.mxu1  ;;  %v799_v56 = vld [vmem:[%s1345_s4 + $0xe0] sm:$0xff]  ;;  %v824_v61 = vld [vmem:[%s1345_s4 + $0x188] sm:$0xff] }
  0xa4   :  { %543 = vmatpush.msra.mxu1 %v799_v56  ;;  %626 = vmatpush.msrb.mxu0 %v824_v61  ;;  %v849_v56 = vld [vmem:[%s1346_s5] ss:$0 sm:$0xff] }
  0xa5   :  { %v311_v2 = vadd.f32 %v305_v1, %v266_v62  ;;  %v182_v3 = vsel %vm178_vm5, %v176_v60, %v180_v0  ;;  %v795_v60 = vld [vmem:[%s1345_s4 + $0xc0] sm:$0xff]  ;;  %v794_v62 = vld [vmem:[%s1345_s4 + $0xb8] sm:$0xff] }
  0xa6   :  { %v738_v4 = vclamps-f32 %v182_v3, 256.0  ;;  %544 = vmatpush.msra.mxu1 %v798_v57  ;;  %v812_v0 = vld [vmem:[%s1345_s4 + $0x138] sm:$0xff]  ;;  %v823_v1 = vld [vmem:[%s1345_s4 + $0x180] sm:$0xff] }
  0xa7   :  { %v317_v5 = vadd.f32 %v848_v63, %v311_v2  ;;  %v792_v2 = vld [vmem:[%s1345_s4 + $0xa8] sm:$0xff]  ;;  %627 = vmatpush.msrb.mxu0 %v823_v1  ;;  %v822_v3 = vld [vmem:[%s1345_s4 + $0x178] sm:$0xff] }
  0xa8   :  { %188 = vst.msk [vmem:[%s1343_s6 + $0x8] sm:$0xff] %vm40_vm2, %v738_v4  ;;  %v345_v23 = vld [vmem:[#allocation3] sm:$0xff]  ;;  %545 = vmatpush.msra.mxu1 %v797_v58 }
  0xa9   :  { %vm319_vm6 = vcmp.ge.f32.partialorder %v317_v5, 0.0  ;;  %v321_v7 = vmul.f32 0.2, %v317_v5  ;;  %190 = vst.msk [vmem:[#allocation3 + $0xa] sm:$0xff] %vm40_vm2, %v738_v4  ;;  %628 = vmatpush.msrb.mxu0 %v822_v3  ;;  %v821_v4 = vld [vmem:[%s1345_s4 + $0x170] sm:$0xff] }
  0xaa   :  { %v268_v8 = vpop.f32.mrf.mxu0  ;;  %546 = vmatpush.msra.mxu1 %v796_v59 }
  0xab   :  { %v323_v9 = vsel %vm319_vm6, %v317_v5, %v321_v7  ;;  %v269_v10 = vadd.f32 %v268_v8, %v239_v6  ;;  %v308_v12 = vpop.f32.mrf.mxu1  ;;  %v791_v5 = vld [vmem:[%s1345_s4 + $0xa0] sm:$0xff]  ;;  %v811_v6 = vld [vmem:[%s1345_s4 + $0x130] sm:$0xff]  ;;  %629 = vmatpush.msrb.mxu0 %v821_v4  ;;  %v820_v7 = vld [vmem:[%s1345_s4 + $0x168] sm:$0xff] }
  0xac   :  { %v763_v11 = vclamps-f32 %v323_v9, 256.0  ;;  %547 = vmatpush.msra.mxu1 %v795_v60  ;;  %v810_v9 = vld [vmem:[%s1345_s4 + $0x128] sm:$0xff] }
  0xad   :  { %v312_v13 = vadd.f32 %v308_v12, %v269_v10  ;;  %v809_v10 = vld [vmem:[%s1345_s4 + $0x120] sm:$0xff]  ;;  %630 = vmatpush.msrb.mxu0 %v820_v7  ;;  %v808_v12 = vld [vmem:[%s1345_s4 + $0x118] sm:$0xff] }
  0xae   :  { %329 = vst.msk [vmem:[%s1343_s6 + $0x10] sm:$0xff] %vm40_vm2, %v763_v11  ;;  %548 = vmatpush.msra.mxu1 %v794_v62 }
  0xaf   :  { %331 = vst.msk [vmem:[#allocation3 + $0x16] sm:$0xff] %vm40_vm2, %v763_v11  ;;  %v318_v14 = vadd.f32 %v848_v63, %v312_v13  ;;  %v793_v63 = vld [vmem:[%s1345_s4 + $0xb0] sm:$0xff]  ;;  %v819_v11 = vld [vmem:[%s1345_s4 + $0x160] sm:$0xff]  ;;  %v818_v13 = vld [vmem:[%s1345_s4 + $0x158] sm:$0xff] }
  0xb0   :  { %v346_v21 = vld [vmem:[#allocation3 + $0x8] sm:$0xff]  ;;  %549 = vmatpush.msra.mxu1 %v793_v63  ;;  %631 = vmatpush.msrb.mxu0 %v819_v11 }
  0xb1   :  { %vm320_vm7 = vcmp.ge.f32.partialorder %v318_v14, 0.0  ;;  %v322_v15 = vmul.f32 0.2, %v318_v14 }
  0xb2   :  { %550 = vmatpush.msra.mxu1 %v792_v2  ;;  %632 = vmatpush.msrb.mxu0 %v818_v13 }
  0xb3   :  { %v324_v16 = vsel %vm320_vm7, %v318_v14, %v322_v15  ;;  %v807_v14 = vld [vmem:[%s1345_s4 + $0x110] sm:$0xff]  ;;  %v836_v15 = vld [vmem:[%s1345_s4 + $0x1d8] sm:$0xff] }
  0xb4   :  { %v764_v17 = vclamps-f32 %v324_v16, 256.0  ;;  %551 = vmatpush.msra.mxu1 %v791_v5 }
  0xb6   :  { %330 = vst.msk [vmem:[%s1343_s6 + $0x18] sm:$0xff] %vm40_vm2, %v764_v17  ;;  %v347_v20 = vld [vmem:[#allocation3 + $0x10] sm:$0xff]  ;;  %668 = vmatpush.msrb.mxu1 %v836_v15 }
  0xb7   :  { %332 = vst.msk [vmem:[#allocation3 + $0x1e] sm:$0xff] %vm40_vm2, %v764_v17  ;;  %v817_v17 = vld [vmem:[%s1345_s4 + $0x150] sm:$0xff] }
  0xb8   :  { %633 = vmatpush.msrb.mxu0 %v817_v17 }
  0xbe   :  { %v349_v18 = vld [vmem:[#allocation3 + $0x20] sm:$0xff]  ;;  %v348_v19 = vld [vmem:[#allocation3 + $0x18] sm:$0xff] }
  0xbf   :  { %398 = vmatpush.msrb.mxu2 %v349_v18  ;;  %841 = vmatpush.msrb.mxu3 %v349_v18  ;;  %v806_v18 = vld [vmem:[%s1345_s4 + $0x108] sm:$0xff] }
  0xc1   :  { %399 = vmatpush.msrb.mxu2 %v348_v19  ;;  %842 = vmatpush.msrb.mxu3 %v348_v19  ;;  %v835_v19 = vld [vmem:[%s1345_s4 + $0x1d0] sm:$0xff] }
  0xc2   :  { %669 = vmatpush.msrb.mxu1 %v835_v19 }
  0xc3   :  { %400 = vmatpush.msrb.mxu2 %v347_v20  ;;  %843 = vmatpush.msrb.mxu3 %v347_v20  ;;  %v805_v20 = vld [vmem:[%s1345_s4 + $0x100] sm:$0xff] }
  0xc5   :  { %401 = vmatpush.msrb.mxu2 %v346_v21  ;;  %844 = vmatpush.msrb.mxu3 %v346_v21  ;;  %v834_v21 = vld [vmem:[%s1345_s4 + $0x1c8] sm:$0xff] }
  0xc6   :  { %670 = vmatpush.msrb.mxu1 %v834_v21 }
  0xc7   :  { %402 = vmatpush.msrb.mxu2 %v345_v23  ;;  %845 = vmatpush.msrb.mxu3 %v345_v23  ;;  %v804_v23 = vld [vmem:[%s1345_s4 + $0xf8] sm:$0xff] }
  0xc8   :  { %765 = vmatmul.msk.f32.vlgmr.msrb.gmra.mxu2 %vm350_vm8, %v333_v22  ;;  %773 = vmatmul.msk.f32.vlgmr.msrb.gmra.mxu3 %vm350_vm8, %v341_v25  ;;  %v816_v22 = vld [vmem:[%s1345_s4 + $0x148] sm:$0xff] }
  0xc9   :  { %473 = vmatpush.msra.mxu3 %v786_v33  ;;  %634 = vmatpush.msrb.mxu0 %v816_v22 }
  0xcb   :  { %474 = vmatpush.msra.mxu3 %v785_v45 }
  0xcd   :  { %475 = vmatpush.msra.mxu3 %v784_v47 }
  0xcf   :  { %476 = vmatpush.msra.mxu3 %v783_v48 }
  0xd0   :  { %766 = vmatmul.msk.f32.gmra.mxu2 %vm350_vm8, %v334_v24  ;;  %774 = vmatmul.msk.f32.gmra.mxu3 %vm350_vm8, %v342_v27  ;;  %v833_v24 = vld [vmem:[%s1345_s4 + $0x1c0] sm:$0xff]  ;;  %v803_v27 = vld [vmem:[%s1345_s4 + $0xf0] sm:$0xff] }
  0xd1   :  { %477 = vmatpush.msra.mxu3 %v782_v49  ;;  %671 = vmatpush.msrb.mxu1 %v833_v24 }
  0xd3   :  { %478 = vmatpush.msra.mxu3 %v781_v50 }
  0xd5   :  { %479 = vmatpush.msra.mxu3 %v780_v51 }
  0xd7   :  { %480 = vmatpush.msra.mxu3 %v779_v52 }
  0xd8   :  { %767 = vmatmul.msk.f32.gmra.mxu2 %vm350_vm8, %v335_v26  ;;  %775 = vmatmul.msk.f32.gmra.mxu3 %vm350_vm8, %v343_v29  ;;  %v815_v26 = vld [vmem:[%s1345_s4 + $0x140] sm:$0xff] }
  0xd9   :  { %481 = vmatpush.msra.mxu3 %v778_v54  ;;  %635 = vmatpush.msrb.mxu0 %v815_v26 }
  0xdb   :  { %482 = vmatpush.msra.mxu3 %v777_v55 }
  0xdd   :  { %584 = vmatpush.msrb.mxu3 %v812_v0 }
  0xdf   :  { %585 = vmatpush.msrb.mxu3 %v811_v6 }
  0xe0   :  { %768 = vmatmul.msk.f32.gmra.mxu2 %vm350_vm8, %v336_v28  ;;  %776 = vmatmul.msk.f32.gmra.mxu3 %vm350_vm8, %v344_v36  ;;  %v832_v28 = vld [vmem:[%s1345_s4 + $0x1b8] sm:$0xff]  ;;  %v827_v36 = vld [vmem:[%s1345_s4 + $0x190] sm:$0xff] }
  0xe1   :  { %586 = vmatpush.msrb.mxu3 %v810_v9  ;;  %672 = vmatpush.msrb.mxu1 %v832_v28 }
  0xe3   :  { %587 = vmatpush.msrb.mxu3 %v809_v10  ;;  %673 = vmatpush.msrb.mxu1 %v831_v30 }
  0xe5   :  { %588 = vmatpush.msrb.mxu3 %v808_v12  ;;  %674 = vmatpush.msrb.mxu1 %v830_v31 }
  0xe7   :  { %589 = vmatpush.msrb.mxu3 %v807_v14  ;;  %675 = vmatpush.msrb.mxu1 %v829_v32 }
  0xe8   :  { %769 = vmatmul.msk.f32.gmra.mxu2 %vm350_vm8, %v337_v35 }
  0xe9   :  { %590 = vmatpush.msrb.mxu3 %v806_v18  ;;  %676 = vmatpush.msrb.mxu1 %v828_v34 }
  0xeb   :  { %591 = vmatpush.msrb.mxu3 %v805_v20  ;;  %677 = vmatpush.msrb.mxu1 %v827_v36 }
  0xed   :  { %592 = vmatpush.msrb.mxu3 %v804_v23 }
  0xef   :  { %593 = vmatpush.msrb.mxu3 %v803_v27 }
  0xf0   :  { %770 = vmatmul.msk.f32.gmra.mxu2 %vm350_vm8, %v338_v39 }
  0xf8   :  { %771 = vmatmul.msk.f32.gmra.mxu2 %vm350_vm8, %v339_v40 }
 0x100   :  { %772 = vmatmul.msk.f32.gmra.mxu2 %vm350_vm8, %v340_v41 }
 0x14b   :  { %v404_v8 = vpop.f32.mrf.mxu2  ;;  %v428_v25 = vpop.f32.mrf.mxu3 }
 0x14c   :  { %789 = vmatmul.msk.f32.vlgmr.msra.gmra.mxu0 %vm32_vm3, %v404_v8 }
 0x153   :  { %v407_v16 = vpop.f32.mrf.mxu2  ;;  %v431_v33 = vpop.f32.mrf.mxu3 }
 0x154   :  { %790 = vmatmul.msk.f32.gmra.mxu0 %vm32_vm3, %v407_v16 }
 0x15b   :  { %v410_v29 = vpop.f32.mrf.mxu2  ;;  %v434_v39 = vpop.f32.mrf.mxu3 }
 0x15c   :  { %787 = vmatmul.msk.f32.vlgmr.msra.gmra.mxu3 %vm32_vm3, %v410_v29  ;;  %825 = vmatmul.msk.f32.vlgmr.msrb.gmra.mxu0 %vm32_vm3, %v428_v25 }
 0x163   :  { %v413_v35 = vpop.f32.mrf.mxu2  ;;  %v437_v41 = vpop.f32.mrf.mxu3 }
 0x164   :  { %788 = vmatmul.msk.f32.gmra.mxu3 %vm32_vm3, %v413_v35  ;;  %826 = vmatmul.msk.f32.gmra.mxu0 %vm32_vm3, %v431_v33 }
 0x16b   :  { %v416_v37 = vpop.f32.mrf.mxu2 }
 0x16c   :  { %801 = vmatmul.msk.f32.vlgmr.msra.gmra.mxu1 %vm32_vm3, %v416_v37 }
 0x173   :  { %v419_v38 = vpop.f32.mrf.mxu2 }
 0x174   :  { %802 = vmatmul.msk.f32.gmra.mxu1 %vm32_vm3, %v419_v38 }
 0x17b   :  { %v422_v40 = vpop.f32.mrf.mxu2 }
 0x17c   :  { %813 = vmatmul.msk.f32.vlgmr.msrb.gmra.mxu3 %vm32_vm3, %v422_v40  ;;  %837 = vmatmul.msk.f32.vlgmr.msrb.gmra.mxu1 %vm32_vm3, %v434_v39 }
 0x183   :  { %v425_v42 = vpop.f32.mrf.mxu2 }
 0x184   :  { %814 = vmatmul.msk.f32.gmra.mxu3 %vm32_vm3, %v425_v42  ;;  %838 = vmatmul.msk.f32.gmra.mxu1 %vm32_vm3, %v437_v41 }
 0x1c9   :  { %v513_v43 = vpop.f32.mrf.mxu0 }
 0x1d1   :  { %v516_v46 = vpop.f32.mrf.mxu0 }
 0x1d9   :  { %v637_v51 = vpop.f32.mrf.mxu0 }
 0x1df   :  { %v484_v44 = vpop.f32.mrf.mxu3 }
 0x1e0   :  { %v514_v49 = vadd.f32 %v513_v43, %v484_v44 }
 0x1e1   :  { %v640_v0 = vpop.f32.mrf.mxu0 }
 0x1e7   :  { %v487_v47 = vpop.f32.mrf.mxu3 }
 0x1e8   :  { %v517_v57 = vadd.f32 %v516_v46, %v487_v47 }
 0x1e9   :  { %v553_v45 = vpop.f32.mrf.mxu1 }
 0x1ea   :  { %v559_v50 = vadd.f32 %v553_v45, %v514_v49 }
 0x1f1   :  { %v556_v48 = vpop.f32.mrf.mxu1 }
 0x1f2   :  { %v560_v59 = vadd.f32 %v556_v48, %v517_v57 }
 0x1f9   :  { %v679_v53 = vpop.f32.mrf.mxu1 }
 0x1ff   :  { %v595_v52 = vpop.f32.mrf.mxu3 }
 0x200   :  { %v601_v54 = vadd.f32 %v595_v52, %v559_v50 }
 0x201   :  { %v682_v1 = vpop.f32.mrf.mxu1 }
 0x202   :  { %v643_v55 = vadd.f32 %v637_v51, %v601_v54 }
 0x204   :  { %v685_v58 = vadd.f32 %v679_v53, %v643_v55 }
 0x206   :  { %v691_v60 = vadd.f32 %v849_v56, %v685_v58 }
 0x207   :  { %v598_v61 = vpop.f32.mrf.mxu3 }
 0x208   :  { %vm693_vm9 = vcmp.ge.f32.partialorder %v691_v60, 0.0  ;;  %v695_v62 = vmul.f32 0.2, %v691_v60  ;;  %v602_v63 = vadd.f32 %v598_v61, %v560_v59 }
 0x20a   :  { %v697_v2 = vsel %vm693_vm9, %v691_v60, %v695_v62  ;;  %v644_v3 = vadd.f32 %v640_v0, %v602_v63 }
 0x20b   :  { %v839_v4 = vclamps-f32 %v697_v2, 256.0 }
 0x20c   :  { %v686_v5 = vadd.f32 %v682_v1, %v644_v3 }
 0x20d   :  { %703 = vst.msk [vmem:[%s1347_s7] sm:$0xff] %vm40_vm2, %v839_v4 }
 0x20e   :  { %v692_v6 = vadd.f32 %v849_v56, %v686_v5 }
 0x210   :  { %vm694_vm10 = vcmp.ge.f32.partialorder %v692_v6, 0.0  ;;  %v696_v7 = vmul.f32 0.2, %v692_v6 }
 0x212   :  { %v698_v8 = vsel %vm694_vm10, %v692_v6, %v696_v7 }
 0x213   :  { %v840_v9 = vclamps-f32 %v698_v8, 256.0 }
 0x215   :  { %704 = vst.msk [vmem:[%s1347_s7 + $0x8] sm:$0xff] %vm40_vm2, %v840_v9 }

</bundles_post_ra>
